<compile_context>
chip_gen: v7x
topology: tpu7x:2x2x1
jax: 0.10.0
libtpu: 0.0.40
codegen_flags: <defaults>
</compile_context>

<pallas_src>
import functools

import jax
import jax.numpy as jnp
from jax.experimental import pallas as pl
from jax.experimental.pallas import tpu as pltpu

_LANE = 128
_SUBLANE_F32 = 8
_MAX_TILE_B = 4096
_MIB = 1024 * 1024


def _round_up(x: int, m: int) -> int:
    return ((x + m - 1) // m) * m


def _cdiv(a: int, b: int) -> int:
    return (a + b - 1) // b


@functools.lru_cache(maxsize=1)
def _vmem_plan():
    """Returns (tile budget bytes, scoped vmem_limit_bytes, min grid tiles)."""
    vmem_bytes = None
    try:
        info = pltpu.get_tpu_info()
        for attr in ("vmem_capacity_bytes", "vmem_bytes", "vmem_size_bytes"):
            v = getattr(info, attr, None)
            if v:
                vmem_bytes = int(v)
                break
    except Exception:
        vmem_bytes = None
    if vmem_bytes is not None and vmem_bytes >= 128 * _MIB:
        # v5e / v6e: 128 MiB physical VMEM -> large tiles amortize the
        # ~0.35 us per-grid-step pipeline overhead on this DMA-bound kernel.
        return 80 * _MIB, 100 * _MIB, 1
    # v7x (64 MiB per TensorCore) or unknown chip: stay conservative and make
    # sure the "parallel" batch axis has >= 2 tiles so both TCs get work.
    return 36 * _MIB, 48 * _MIB, 2


def _choose_tile_b(batch: int, d: int, in_itemsize: int, budget: int,
                   min_tiles: int, sublane: int) -> int:
    # Per-row VMEM cost: 3 inputs x 2 pipeline buffers + ~4 f32 temporaries.
    per_row = 3 * 2 * d * in_itemsize + 4 * d * 4
    tb = max(sublane, budget // per_row)
    tb = min(tb, _MAX_TILE_B)
    if min_tiles > 1:
        tb = min(tb, _round_up(_cdiv(batch, min_tiles), sublane))
    # Balance: fix the tile count first, then size tiles evenly so the last
    # (partial) tile is never nearly empty.
    n_tiles = max(1, _cdiv(batch, tb))
    tb = _round_up(_cdiv(batch, n_tiles), sublane)
    return max(sublane, int(tb))


def _make_triplet_kernel(margin: float, batch: int, tile_b: int):
    def kernel(a_ref, p_ref, n_ref, out_ref):
        a = a_ref[...].astype(jnp.float32)
        p = p_ref[...].astype(jnp.float32)
        n = n_ref[...].astype(jnp.float32)

        dp = a - p
        dn = a - n
        # Fused feature reduction: sum((a-p)^2) - sum((a-n)^2) == sum(dp^2 - dn^2).
        row = jnp.sum(dp * dp - dn * dn, axis=-1, keepdims=True)   # (tile_b, 1)
        losses = jnp.maximum(row + jnp.float32(margin), 0.0)        # (tile_b, 1)

        def _write(vals):
            s = jnp.sum(vals, axis=0, keepdims=True)                # (1, 1)
            # One full (8,128) slab per tile -> single unmasked lane-dense store.
            out_ref[...] = jnp.broadcast_to(s, out_ref.shape)

        if batch % tile_b == 0:
            # Static fast path: no padded rows anywhere, no mask epilogue.
            _write(losses)
        else:
            i = pl.program_id(0)
            last = pl.num_programs(0) - 1

            @pl.when(i != last)
            def _():
                _write(losses)

            @pl.when(i == last)
            def _():
                # Only the last (partial) tile has rows beyond the batch; mask
                # them so garbage/stale VMEM rows contribute 0.
                row_ids = i * tile_b + jax.lax.broadcasted_iota(
                    jnp.int32, (tile_b, 1), 0)
                _write(jnp.where(row_ids < batch, losses, jnp.float32(0.0)))

    return kernel


@functools.partial(jax.jit, static_argnames=("margin",))
def triplet_loss(anchor, positive, negative, margin: float = 1.0):
    """Pallas TPU implementation of TripletLoss.forward. Returns a scalar."""
    assert anchor.shape == positive.shape == negative.shape
    assert anchor.dtype == positive.dtype == negative.dtype
    assert anchor.ndim == 2
    B, D = anchor.shape
    itemsize = jnp.dtype(anchor.dtype).itemsize

    budget, vmem_limit, min_tiles = _vmem_plan()
    # Sub-32-bit dtypes pack along sublanes: (8,128) f32 / (16,128) bf16 / (32,128) i8.
    sublane = max(_SUBLANE_F32, 32 // itemsize)

    tile_b = _choose_tile_b(B, D, itemsize, budget, min_tiles, sublane)
    num_tiles = _cdiv(B, tile_b)

    min_tile_bytes = sublane * (3 * 2 * D * itemsize + 4 * D * 4)
    if min_tile_bytes > vmem_limit:
        # TODO(synk): tile the feature axis for extremely wide embeddings.
        raise ValueError(
            f"feature dim {D} too large for a single-pass feature block")

    kernel = _make_triplet_kernel(float(margin), B, tile_b)

    # Full-extent feature block (no lane padding needed); batch tiled with a
    # partial last block.
    in_block = pl.BlockSpec((tile_b, D), lambda i: (i, 0))

    partial_sums = pl.pallas_call(
        kernel,
        out_shape=jax.ShapeDtypeStruct((num_tiles, _SUBLANE_F32, _LANE),
                                       jnp.float32),
        grid_spec=pltpu.PrefetchScalarGridSpec(
            num_scalar_prefetch=0,
            grid=(num_tiles,),
            in_specs=[in_block, in_block, in_block],
            out_specs=pl.BlockSpec((1, _SUBLANE_F32, _LANE),
                                   lambda i: (i, 0, 0)),
        ),
        compiler_params=pltpu.CompilerParams(
            dimension_semantics=("parallel",),
            vmem_limit_bytes=vmem_limit,
        ),
    )(anchor, positive, negative)

    # Each tile broadcast its partial sum across its (8,128) slab; element
    # [t, 0, 0] carries it exactly.  Batch mean finishes in plain JAX.
    return jnp.sum(partial_sums[:, 0, 0]) / jnp.float32(B)


def triplet_loss_ref(anchor, positive, negative, margin: float = 1.0):
    """Pure-JAX reference matching the PyTorch module (computed in f32)."""
    a = anchor.astype(jnp.float32)
    p = positive.astype(jnp.float32)
    n = negative.astype(jnp.float32)
    dpos = jnp.sum((a - p) ** 2, axis=1)
    dneg = jnp.sum((a - n) ** 2, axis=1)
    losses = jax.nn.relu(dpos - dneg + margin)
    return jnp.mean(losses)


if __name__ == "__main__":
    key = jax.random.PRNGKey(0)
    keys = jax.random.split(key, 9)

    # 1) Small aligned f32 case (typical (batch, embedding) FSL shapes).
    B, D = 8, 32
    a1 = jax.random.normal(keys[0], (B, D), dtype=jnp.float32)
    p1 = jax.random.normal(keys[1], (B, D), dtype=jnp.float32)
    n1 = jax.random.normal(keys[2], (B, D), dtype=jnp.float32)
    out1 = jax.block_until_ready(triplet_loss(a1, p1, n1, margin=1.0))
    ref1 = triplet_loss_ref(a1, p1, n1, margin=1.0)
    assert jnp.allclose(out1, ref1, rtol=1e-4, atol=1e-4), (out1, ref1)

    # 2) Unaligned f32 case: exercises the partial last block + row mask and
    #    the non-128-multiple feature axis (no wrapper-side padding).
    B2, D2 = 13, 200
    a2 = jax.random.normal(keys[3], (B2, D2), dtype=jnp.float32)
    p2 = jax.random.normal(keys[4], (B2, D2), dtype=jnp.float32)
    n2 = jax.random.normal(keys[5], (B2, D2), dtype=jnp.float32)
    out2 = jax.block_until_ready(triplet_loss(a2, p2, n2, margin=0.5))
    ref2 = triplet_loss_ref(a2, p2, n2, margin=0.5)
    assert jnp.allclose(out2, ref2, rtol=1e-4, atol=1e-4), (out2, ref2)

    # 3) bf16 case: narrow dtype stays narrow through the DMA (16-row sublane
    #    rounding), widened to f32 in-kernel.
    B3, D3 = 35, 256
    a3 = jax.random.normal(keys[6], (B3, D3), dtype=jnp.bfloat16)
    p3 = jax.random.normal(keys[7], (B3, D3), dtype=jnp.bfloat16)
    n3 = jax.random.normal(keys[8], (B3, D3), dtype=jnp.bfloat16)
    out3 = jax.block_until_ready(triplet_loss(a3, p3, n3, margin=1.0))
    ref3 = triplet_loss_ref(a3, p3, n3, margin=1.0)
    assert jnp.allclose(out3, ref3, rtol=1e-4, atol=1e-4), (out3, ref3)

    print("KERNEL_OK")
</pallas_src>

<mosaic_0001>
module attributes {stable_mosaic.version = 11 : i64} {
  func.func @kernel(%arg0: i32, %arg1: memref<8x32xf32, #tpu.memory_space<vmem>>, %arg2: memref<8x32xf32, #tpu.memory_space<vmem>>, %arg3: memref<8x32xf32, #tpu.memory_space<vmem>>, %arg4: memref<1x8x128xf32, #tpu.memory_space<vmem>>) attributes {dimension_semantics = [#tpu.dimension_semantics<parallel>], iteration_bounds = array<i64: 1>, scalar_prefetch = 0 : i64, scratch_operands = 0 : i64, tpu.core_type = #tpu.core_type<tc>, window_params = [{transform_indices = @transform_0, window_bounds = array<i64: 8, 32>}, {transform_indices = @transform_1, window_bounds = array<i64: 8, 32>}, {transform_indices = @transform_2, window_bounds = array<i64: 8, 32>}, {transform_indices = @transform_3, window_bounds = array<i64: 1, 8, 128>}]} {
    %c0 = arith.constant 0 : index
    %c0_0 = arith.constant 0 : index
    %0 = vector.load %arg1[%c0, %c0_0] : memref<8x32xf32, #tpu.memory_space<vmem>>, vector<8x32xf32>
    %c0_1 = arith.constant 0 : index
    %c0_2 = arith.constant 0 : index
    %1 = vector.load %arg2[%c0_1, %c0_2] : memref<8x32xf32, #tpu.memory_space<vmem>>, vector<8x32xf32>
    %c0_3 = arith.constant 0 : index
    %c0_4 = arith.constant 0 : index
    %2 = vector.load %arg3[%c0_3, %c0_4] : memref<8x32xf32, #tpu.memory_space<vmem>>, vector<8x32xf32>
    %3 = arith.subf %0, %1 : vector<8x32xf32>
    %4 = arith.subf %0, %2 : vector<8x32xf32>
    %5 = arith.mulf %3, %3 : vector<8x32xf32>
    %6 = arith.mulf %4, %4 : vector<8x32xf32>
    %7 = arith.subf %5, %6 : vector<8x32xf32>
    %cst = arith.constant dense<0.000000e+00> : vector<8xf32>
    %8 = vector.multi_reduction <add>, %7, %cst [1] : vector<8x32xf32> to vector<8xf32>
    %9 = vector.shape_cast %8 : vector<8xf32> to vector<8x1xf32>
    %cst_5 = arith.constant 1.000000e+00 : f32
    %10 = vector.broadcast %cst_5 : f32 to vector<8x1xf32>
    %11 = arith.addf %9, %10 : vector<8x1xf32>
    %cst_6 = arith.constant 0.000000e+00 : f32
    %12 = vector.broadcast %cst_6 : f32 to vector<8x1xf32>
    %13 = arith.maximumf %11, %12 : vector<8x1xf32>
    %cst_7 = arith.constant dense<0.000000e+00> : vector<1xf32>
    %14 = vector.multi_reduction <add>, %13, %cst_7 [0] : vector<8x1xf32> to vector<1xf32>
    %15 = vector.shape_cast %14 : vector<1xf32> to vector<1x1xf32>
    %16 = vector.shape_cast %15 : vector<1x1xf32> to vector<1x1x1xf32>
    %17 = vector.broadcast %16 : vector<1x1x1xf32> to vector<1x8x128xf32>
    %c0_8 = arith.constant 0 : index
    %c0_9 = arith.constant 0 : index
    %c0_10 = arith.constant 0 : index
    %18 = vector.load %arg4[%c0_8, %c0_9, %c0_10] : memref<1x8x128xf32, #tpu.memory_space<vmem>>, vector<1x8x128xf32>
    tpu.vector_store %arg4[%c0_8, %c0_9, %c0_10], %17 {strides = array<i32>} : memref<1x8x128xf32, #tpu.memory_space<vmem>>, vector<1x8x128xf32>,
    return
  }
  func.func @transform_0(%arg0: i32) -> (i32, i32) {
    %c0_i32 = arith.constant 0 : i32
    %c0_i32_0 = arith.constant 0 : i32
    return %arg0, %c0_i32 : i32, i32
  }
  func.func @transform_1(%arg0: i32) -> (i32, i32) {
    %c0_i32 = arith.constant 0 : i32
    %c0_i32_0 = arith.constant 0 : i32
    return %arg0, %c0_i32 : i32, i32
  }
  func.func @transform_2(%arg0: i32) -> (i32, i32) {
    %c0_i32 = arith.constant 0 : i32
    %c0_i32_0 = arith.constant 0 : i32
    return %arg0, %c0_i32 : i32, i32
  }
  func.func @transform_3(%arg0: i32) -> (i32, i32, i32) {
    %c0_i32 = arith.constant 0 : i32
    %c0_i32_0 = arith.constant 0 : i32
    %c0_i32_1 = arith.constant 0 : i32
    return %arg0, %c0_i32, %c0_i32_0 : i32, i32, i32
  }
}

</mosaic_0001>

<bundles_post_ra>
// kernel: triplet_loss.1
= control target key start
LH: loop header
LB: loop body
LE: loop exit
PB: predicated region body
PF: predicated region fallthrough
CT: control target
= control target key end

     0   :  { %8 = vsyncpa [#allocation3], 0  ;;  %s211_s0 = inlined_call_operand.hbm [shape: f32[8,32], index: 0, kind: input, shape index: {}]   ;;  %s212_s1 = inlined_call_operand.hbm [shape: f32[8,32], index: 1, kind: input, shape index: {}]   ;;  %s213_s2 = inlined_call_operand.hbm [shape: f32[8,32], index: 2, kind: input, shape index: {}]   ;;  %s214_s3 = inlined_call_operand.vmem [shape: f32[1,8,128], index: 3, kind: output, shape index: {}]  }
   0x1   :  { %9 = vsyncpa [#allocation5], 0  ;;  %s149_s12 = smov [#allocation4]   ;;  %s150_s14 = smov [#allocation2]  }
   0x2   :  { %s26_s13 = sshll.u32 %s149_s12, 4  ;;  %s16_s15 = sshll.u32 %s150_s14, 4  ;;  %s27_s13 = int_to_ptr.vmem [resolvable:$true] %s26_s13  ;;  %s17_s15 = int_to_ptr.vmem [resolvable:$true] %s16_s15 }
   0x3   :  { %s79_s18 = scalar_lea.hbm %s212_s1, 128 }
   0x4   :  { %p80_p0 = scmp.ne.s32.totalorder %s212_s1, %s79_s18  ;;  %p83_p1 = scmp.lt.u32.totalorder %s79_s18, %s212_s1 }
   0x6   :  { %p85_p2 = pnand %p83_p1, %p80_p0 }
   0x8   :  { %88 = shalt.err (!%p85_p2)
}
   0x9   :  { %s89_s23 = scalar_lea.vmem %s27_s13, 128  ;;  %p94_p4 = scmp.lt.s32.totalorder %s27_s13, %s27_s13 }
   0xa   :  { %p90_p3 = scmp.ne.s32.totalorder %s27_s13, %s89_s23  ;;  %p95_p5 = scmp.lt.s32.totalorder %s89_s23, %s89_s23 }
   0xc   :  { %p96_p6 = por %p95_p5, %p94_p4 }
   0xe   :  { %p97_p7 = pnand %p96_p6, %p90_p3 }
  0x10   :  { %100 = shalt.err (!%p97_p7)
}
  0x11   :  { %29 = dma.hbm_to_vmem [thread:$0]  %s212_s1, 128, %s27_s13, [#allocation5]  }
  0x12   :  { %s101_s28 = scalar_lea.hbm %s211_s0, 128 }
  0x13   :  { %p102_p8 = scmp.ne.s32.totalorder %s211_s0, %s101_s28  ;;  %p105_p9 = scmp.lt.u32.totalorder %s101_s28, %s211_s0 }
  0x15   :  { %p107_p10 = pnand %p105_p9, %p102_p8 }
  0x17   :  { %110 = shalt.err (!%p107_p10)
}
  0x18   :  { %s111_s6 = scalar_lea.vmem %s17_s15, 128  ;;  %p116_p12 = scmp.lt.s32.totalorder %s17_s15, %s17_s15 }
  0x19   :  { %p112_p11 = scmp.ne.s32.totalorder %s17_s15, %s111_s6  ;;  %p117_p13 = scmp.lt.s32.totalorder %s111_s6, %s111_s6 }
  0x1b   :  { %p118_p0 = por %p117_p13, %p116_p12 }
  0x1d   :  { %p119_p1 = pnand %p118_p0, %p112_p11 }
  0x1f   :  { %122 = shalt.err (!%p119_p1)
}
  0x20   :  { %19 = dma.hbm_to_vmem [thread:$0]  %s211_s0, 128, %s17_s15, [#allocation3]  }
  0x21   :  { %s151_s8 = smov [#allocation6]   ;;  %s123_s12 = scalar_lea.hbm %s213_s2, 128 }
  0x22   :  { %s36_s9 = sshll.u32 %s151_s8, 4  ;;  %p124_p2 = scmp.ne.s32.totalorder %s213_s2, %s123_s12  ;;  %s37_s9 = int_to_ptr.vmem [resolvable:$true] %s36_s9 }
  0x23   :  { %p127_p3 = scmp.lt.u32.totalorder %s123_s12, %s213_s2 }
  0x25   :  { %p129_p4 = pnand %p127_p3, %p124_p2 }
  0x27   :  { %132 = shalt.err (!%p129_p4)
}
  0x28   :  { %s133_s18 = scalar_lea.vmem %s37_s9, 128  ;;  %p138_p6 = scmp.lt.s32.totalorder %s37_s9, %s37_s9 }
  0x29   :  { %p134_p5 = scmp.ne.s32.totalorder %s37_s9, %s133_s18  ;;  %p139_p7 = scmp.lt.s32.totalorder %s133_s18, %s133_s18 }
  0x2b   :  { %p140_p8 = por %p139_p7, %p138_p6 }
  0x2d   :  { %p141_p9 = pnand %p140_p8, %p134_p5 }
  0x2f   :  { %144 = shalt.err (!%p141_p9)
}
  0x30   :  { %39 = dma.hbm_to_vmem [thread:$0]  %s213_s2, 128, %s37_s9, [#allocation5]  }
  0x31   :  { %145 = dma.done.wait [#allocation3], 128  }
  0x32   :  { %146 = vsyncadd [#allocation3], 4294967168 }
  0x33   :  { %147 = dma.done.wait [#allocation5], 256  }
  0x34   :  { %148 = vsyncadd [#allocation5], 4294967040  ;;  %v49_v0 = vld [vmem:[#allocation2] sm:$0xff]  ;;  %v50_v1 = vld [vmem:[#allocation4] sm:$0xff]  ;;  %vm57_vm0 = vcmask 261120  }
  0x35   :  { %v51_v2 = vld [vmem:[#allocation6] sm:$0xff]  ;;  %v52_v3 = vsub.f32 %v49_v0, %v50_v1 }
  0x36   :  { %v53_v4 = vsub.f32 %v49_v0, %v51_v2 }
  0x37   :  { %v54_v5 = vmul.f32 %v52_v3, %v52_v3 }
  0x38   :  { %v55_v6 = vmul.f32 %v53_v4, %v53_v4 }
  0x3a   :  { %v56_v7 = vsub.f32 %v54_v5, %v55_v6 }
  0x3c   :  { %v58_v8 = vsel %vm57_vm0, %v56_v7, 0.0 }
  0x3d   :  { %59 = vadd.xlane.f32.xlu0 %v58_v8 }
  0xca   :  { %v60_v9 = vpop.xlane.xlu0 %59 }
  0xcb   :  { %v61_v10 = vadd.f32 1.0, %v60_v9 }
  0xcd   :  { %v62_v11 = vmax.f32 %v61_v10, 0.0 }
  0xcf   :  { %v63_v12 = vrot.slane %v62_v11, 4 }
  0xd1   :  { %v64_v13 = vadd.f32 %v63_v12, %v62_v11 }
  0xd3   :  { %v65_v14 = vrot.slane %v64_v13, 2 }
  0xd5   :  { %v66_v15 = vadd.f32 %v65_v14, %v64_v13 }
  0xd7   :  { %v67_v16 = vrot.slane %v66_v15, 1 }
  0xd9   :  { %v68_v17 = vadd.f32 %v67_v16, %v66_v15 }
  0xdb   :  { %69 = vst [vmem:[%s214_s3] sm:$0xff] %v68_v17 }
  0xdc   :  { %74 = vsyncpa [#allocation3], 1 }
  0xdd   :  { %75 = vsyncpa [#allocation5], 1 }

</bundles_post_ra>
